<compile_context>
chip_gen: v5e
topology: v5e:2x2
jax: 0.10.0
libtpu: 0.0.40
codegen_flags: <defaults>
</compile_context>

<pallas_src>
import jax
import jax.numpy as jnp
from jax.experimental import pallas as pl
from jax.experimental.pallas import tpu as pltpu


_LANE = 128                  # class axis padded to a lane-dense multiple of 128
_MAX_TB = 512                # max batch-tile rows (amortizes ~0.35 us/step overhead;
                             # 1024 is marginally better on v5e/v6e when VMEM allows)
_MIN_MEGACORE_ROWS = 256     # split a lone batch tile in two when B >= this (v7x)
_W_VMEM_TARGET = 8 << 20     # split the D axis once one W slab exceeds this
_VMEM_TARGET = 40 << 20      # per-call VMEM budget target (fits v7x's 64 MiB/TC)
_NEG_BIG = -1e30             # bias value for padded class lanes (exp(.) == 0)


def _round_up(x, m):
    return ((x + m - 1) // m) * m


def _sublane(dtype):
    # Sublane packing granularity: 8 rows for 4-byte, 16 for 2-byte, 32 for 1-byte.
    return max(8, 32 // jnp.dtype(dtype).itemsize)


def _classifier_kernel(x_ref, w_ref, b_ref, out_ref, acc_ref):
    # x_ref  : (TB, TD)    caller dtype -- streamed per (batch, d) grid step
    # w_ref  : (TD, Kpad)  caller dtype -- constant block index when TD == D
    # b_ref  : (1, Kpad)   f32, padded class lanes pre-filled with -1e30
    # out_ref: (TB, Kpad)  probabilities (block index constant across the d axis)
    # acc_ref: (TB, Kpad)  f32 accumulator scratch
    j = pl.program_id(1)

    @pl.when(j == 0)
    def _init():
        acc_ref[...] = jnp.zeros_like(acc_ref)

    acc_ref[...] += jnp.dot(x_ref[...], w_ref[...],
                            preferred_element_type=jnp.float32)

    @pl.when(j == pl.num_programs(1) - 1)
    def _finalize():
        # Padded class lanes carry -1e30 from the bias, so no explicit mask is
        # needed: they contribute exp(.) == 0 to the row-wise softmax.
        logits = acc_ref[...] + b_ref[...]
        m = jnp.max(logits, axis=-1, keepdims=True)
        e = jnp.exp(logits - m)
        denom = jnp.sum(e, axis=-1, keepdims=True)
        # HBM-bound kernel -> the exact reciprocal is effectively free and keeps
        # every row summing to 1 at f32 precision.
        inv = pl.reciprocal(denom, approx=False)
        out_ref[...] = (e * inv).astype(out_ref.dtype)


def prepare_classifier_params(weight, bias, compute_dtype=None):
    """Pads (W, b) once at parameter-load time (hoisted out of the per-call path).

    weight : (D, K) linear weight.
    bias   : (K,)   linear bias.
    Returns (w_padded, b_padded, num_classes).  The class axis is padded to a
    lane-dense multiple of 128; padded bias lanes hold -1e30 so the kernel needs
    no explicit class mask.
    """
    D, K = weight.shape
    dtype = jnp.dtype(compute_dtype) if compute_dtype is not None else weight.dtype
    k_pad = _round_up(K, _LANE)
    w_p = jnp.zeros((D, k_pad), dtype).at[:, :K].set(weight.astype(dtype))
    b_p = jnp.full((1, k_pad), _NEG_BIG, jnp.float32).at[0, :K].set(
        bias.astype(jnp.float32).reshape(K))
    return w_p, b_p, K


def _choose_block_d(D, k_pad, itemsize):
    # Keep W fully VMEM-resident when it is small; otherwise split the contraction
    # axis into equal, lane-aligned tiles that divide D exactly (partial tiles on
    # a contraction axis would pollute the accumulation).
    if D * k_pad * itemsize <= _W_VMEM_TARGET:
        return D
    max_block_d = max(_LANE, (_W_VMEM_TARGET // (k_pad * itemsize)) // _LANE * _LANE)
    for block_d in range(max_block_d, _LANE - 1, -_LANE):
        if D % block_d == 0:
            return block_d
    # TODO(synk): for huge D with no lane-aligned divisor, pad D once at
    # parameter-prep time instead of falling back to a full-D resident W.
    return D


def _choose_block_b(B, sublane, row_bytes):
    # Balanced batch tiles: cap at _MAX_TB rows, keep tiles a multiple of the
    # dtype sublane granularity, never stream padded rows.
    n_tiles = pl.cdiv(B, _MAX_TB)
    if n_tiles == 1 and B >= _MIN_MEGACORE_ROWS:
        n_tiles = 2                       # >=2 grid steps so v7x megacore can shard
    block_b = _round_up(pl.cdiv(B, n_tiles), sublane)
    # Shrink until the per-row VMEM (x double-buffer + out + acc) fits the target.
    while block_b > sublane and block_b * row_bytes > _VMEM_TARGET:
        block_b = _round_up(block_b // 2, sublane)
    if block_b >= B:
        block_b = B                       # single full-extent tile (always legal)
    return block_b


def multiclass_probabilities(x, weight=None, bias=None, *, prepared=None,
                             block_b=None, out_dtype=jnp.float32):
    """softmax(flatten(x) @ W + b, axis=-1), fused in one Pallas TPU kernel.

    x        : (B, ...) activations, flattened to (B, D).  dtype preserved (f32/bf16).
    prepared : optional result of prepare_classifier_params (hoists W/b padding).
    Returns (B, K) probabilities in `out_dtype` (f32 by default).
    """
    B = x.shape[0]
    x2d = x.reshape(B, -1)                       # keep caller dtype
    D = x2d.shape[1]

    if prepared is None:
        if weight is None or bias is None:
            raise ValueError("pass (weight, bias) or prepared=prepare_classifier_params(...)")
        prepared = prepare_classifier_params(weight, bias, x2d.dtype)
    w_p, b_p, K = prepared
    w_p = w_p.astype(x2d.dtype)                  # no-op when prepared with matching dtype
    k_pad = w_p.shape[1]

    itemsize = jnp.dtype(x2d.dtype).itemsize
    out_itemsize = jnp.dtype(out_dtype).itemsize

    block_d = _choose_block_d(D, k_pad, itemsize)
    n_d = D // block_d

    sublane = _sublane(x2d.dtype)
    # Per-batch-row VMEM: double-buffered x tile + double-buffered out tile + acc.
    row_bytes = 2 * block_d * itemsize + 2 * k_pad * out_itemsize + k_pad * 4
    if block_b is None:
        block_b = _choose_block_b(B, sublane, row_bytes)
    else:
        block_b = min(_round_up(int(block_b), sublane), _round_up(B, sublane))
        if block_b >= B:
            block_b = B

    grid = (pl.cdiv(B, block_b), n_d)

    # Explicit scoped-VMEM budget (defaults are only 16 MiB on v5e, 32 MiB on v6e+);
    # capped at 64 MiB so it is valid on v7x as well.
    w_bufs = 1 if n_d == 1 else 2
    vmem_bytes = block_b * row_bytes + w_bufs * (block_d * k_pad * itemsize + k_pad * 4)
    vmem_limit = min(max(int(vmem_bytes * 1.25) + (2 << 20), 16 << 20), 64 << 20)

    cost = pl.CostEstimate(
        flops=2 * B * D * k_pad,
        transcendentals=B * k_pad,
        bytes_accessed=(B * D + D * k_pad) * itemsize + B * k_pad * out_itemsize,
    )

    def build(single_buffer_params):
        pmode = dict(pipeline_mode=pl.Buffered(1)) if single_buffer_params else {}
        return pl.pallas_call(
            _classifier_kernel,
            out_shape=jax.ShapeDtypeStruct((B, k_pad), out_dtype),
            grid=grid,
            in_specs=[
                # x: streamed / double-buffered over (batch, d) tiles.
                pl.BlockSpec((block_b, block_d), lambda i, j: (i, j)),
                # W, b: block index independent of the batch axis -> fetched once
                # per distinct d tile; single-buffered when fully resident.
                pl.BlockSpec((block_d, k_pad), lambda i, j: (j, 0), **pmode),
                pl.BlockSpec((1, k_pad), lambda i, j: (0, 0), **pmode),
            ],
            out_specs=pl.BlockSpec((block_b, k_pad), lambda i, j: (i, 0)),
            scratch_shapes=[pltpu.VMEM((block_b, k_pad), jnp.float32)],
            compiler_params=pltpu.CompilerParams(
                dimension_semantics=("parallel", "arbitrary"),
                vmem_limit_bytes=vmem_limit,
            ),
            cost_estimate=cost,
        )

    # pl.Buffered(1) halves the VMEM held by the resident W/b; fall back to the
    # default double-buffering if this JAX build rejects single-buffered specs.
    try:
        out = build(single_buffer_params=(n_d == 1))(x2d, w_p, b_p)
    except Exception:
        out = build(single_buffer_params=False)(x2d, w_p, b_p)

    return out[:, :K]


def reference_probabilities(x, weight, bias):
    B = x.shape[0]
    logits = (x.reshape(B, -1).astype(jnp.float32)
              @ weight.astype(jnp.float32)
              + bias.astype(jnp.float32))
    return jax.nn.softmax(logits, axis=-1)


if __name__ == "__main__":
    # Small shapes consistent with a classifier over NCHW images.
    batch, channels, spatial = 2, 4, 16
    num_classes = 10
    D = channels * spatial * spatial                      # 1024

    key = jax.random.PRNGKey(0)
    kx, kw, kb, kx2 = jax.random.split(key, 4)

    x = jax.random.normal(kx, (batch, channels, spatial, spatial), dtype=jnp.float32)

    # Deterministic parameter init (nn.Linear-style uniform scale 1/sqrt(D)).
    scale = 1.0 / jnp.sqrt(jnp.float32(D))
    weight = jax.random.uniform(kw, (D, num_classes), jnp.float32, -scale, scale)
    bias = jax.random.uniform(kb, (num_classes,), jnp.float32, -scale, scale)

    # --- f32 path, parameters pre-padded once (hoisted out of the call path) ----
    prep_f32 = prepare_classifier_params(weight, bias, jnp.float32)
    probs = jax.block_until_ready(multiclass_probabilities(x, prepared=prep_f32))
    ref = reference_probabilities(x, weight, bias)
    assert probs.shape == (batch, num_classes)
    assert jnp.allclose(jnp.sum(probs, axis=-1), 1.0, atol=1e-3)
    assert jnp.allclose(probs, ref, atol=2e-3, rtol=2e-3)

    # --- bf16-operand path (half the HBM bytes on the x stream; f32 accumulation) ---
    prep_bf16 = prepare_classifier_params(weight, bias, jnp.bfloat16)
    probs_bf16 = jax.block_until_ready(
        multiclass_probabilities(x.astype(jnp.bfloat16), prepared=prep_bf16))
    ref_bf16 = reference_probabilities(x.astype(jnp.bfloat16),
                                       weight.astype(jnp.bfloat16), bias)
    assert probs_bf16.shape == (batch, num_classes)
    assert jnp.allclose(probs_bf16, ref_bf16, atol=2e-2, rtol=2e-2)

    # --- unaligned batch, multi-step batch grid (exercises the partial last tile) ---
    x20 = jax.random.normal(kx2, (20, channels, spatial, spatial), dtype=jnp.float32)
    probs20 = jax.block_until_ready(
        multiclass_probabilities(x20, weight, bias, block_b=8))
    ref20 = reference_probabilities(x20, weight, bias)
    assert probs20.shape == (20, num_classes)
    assert jnp.allclose(probs20, ref20, atol=2e-3, rtol=2e-3)

    # TODO(synk): `train_batch` (CrossEntropyLoss backward + optimizer step) is
    # training-time logic, not part of the forward pass, and is not kernelized.
    print("KERNEL_OK")
</pallas_src>

<mosaic_0001>
module attributes {stable_mosaic.version = 11 : i64} {
  func.func @_classifier_kernel(%arg0: i32, %arg1: i32, %arg2: memref<2x1024xf32, #tpu.memory_space<vmem>>, %arg3: memref<1024x128xf32, #tpu.memory_space<vmem>>, %arg4: memref<1x128xf32, #tpu.memory_space<vmem>>, %arg5: memref<2x128xf32, #tpu.memory_space<vmem>>, %arg6: memref<2x128xf32, #tpu.memory_space<vmem>>) attributes {dimension_semantics = [#tpu.dimension_semantics<parallel>, #tpu.dimension_semantics<arbitrary>], iteration_bounds = array<i64: 1, 1>, scalar_prefetch = 0 : i64, scratch_operands = 1 : i64, tpu.core_type = #tpu.core_type<tc>, window_params = [{transform_indices = @transform_0, window_bounds = array<i64: 2, 1024>}, {pipeline_mode = #tpu.pipeline_mode<synchronous>, transform_indices = @transform_1, window_bounds = array<i64: 1024, 128>}, {pipeline_mode = #tpu.pipeline_mode<synchronous>, transform_indices = @transform_2, window_bounds = array<i64: 1, 128>}, {transform_indices = @transform_3, window_bounds = array<i64: 2, 128>}]} {
    %c0_i32 = arith.constant 0 : i32
    %0 = arith.cmpi eq, %arg1, %c0_i32 : i32
    %1 = arith.extui %0 : i1 to i32
    %c0_i32_0 = arith.constant 0 : i32
    %2 = arith.cmpi ne, %1, %c0_i32_0 : i32
    scf.if %2 {
      %cst_10 = arith.constant 0.000000e+00 : f32
      %12 = vector.broadcast %cst_10 : f32 to vector<2x128xf32>
      %c0_11 = arith.constant 0 : index
      %c0_12 = arith.constant 0 : index
      %13 = vector.load %arg6[%c0_11, %c0_12] : memref<2x128xf32, #tpu.memory_space<vmem>>, vector<2x128xf32>
      tpu.vector_store %arg6[%c0_11, %c0_12], %12 {strides = array<i32>} : memref<2x128xf32, #tpu.memory_space<vmem>>, vector<2x128xf32>,
    } else {
    }
    %c0 = arith.constant 0 : index
    %c0_1 = arith.constant 0 : index
    %3 = vector.load %arg6[%c0, %c0_1] : memref<2x128xf32, #tpu.memory_space<vmem>>, vector<2x128xf32>
    %c0_2 = arith.constant 0 : index
    %c0_3 = arith.constant 0 : index
    %4 = vector.load %arg2[%c0_2, %c0_3] : memref<2x1024xf32, #tpu.memory_space<vmem>>, vector<2x1024xf32>
    %c0_4 = arith.constant 0 : index
    %c0_5 = arith.constant 0 : index
    %5 = vector.load %arg3[%c0_4, %c0_5] : memref<1024x128xf32, #tpu.memory_space<vmem>>, vector<1024x128xf32>
    %cst = arith.constant dense<0.000000e+00> : vector<2x128xf32>
    %6 = tpu.matmul %4, %5, %cst {dimension_numbers = #tpu.dot_dimension_numbers<[1], [0], [0], [1], [0, 0, 1, 1], [], []>} : vector<2x1024xf32>, vector<1024x128xf32>, vector<2x128xf32> -> vector<2x128xf32>
    %7 = arith.addf %3, %6 : vector<2x128xf32>
    %c0_6 = arith.constant 0 : index
    %c0_7 = arith.constant 0 : index
    %8 = vector.load %arg6[%c0_6, %c0_7] : memref<2x128xf32, #tpu.memory_space<vmem>>, vector<2x128xf32>
    tpu.vector_store %arg6[%c0_6, %c0_7], %7 {strides = array<i32>} : memref<2x128xf32, #tpu.memory_space<vmem>>, vector<2x128xf32>,
    %c0_i32_8 = arith.constant 0 : i32
    %9 = arith.cmpi eq, %arg1, %c0_i32_8 : i32
    %10 = arith.extui %9 : i1 to i32
    %c0_i32_9 = arith.constant 0 : i32
    %11 = arith.cmpi ne, %10, %c0_i32_9 : i32
    scf.if %11 {
      %c0_10 = arith.constant 0 : index
      %c0_11 = arith.constant 0 : index
      %12 = vector.load %arg6[%c0_10, %c0_11] : memref<2x128xf32, #tpu.memory_space<vmem>>, vector<2x128xf32>
      %c0_12 = arith.constant 0 : index
      %c0_13 = arith.constant 0 : index
      %13 = vector.load %arg4[%c0_12, %c0_13] : memref<1x128xf32, #tpu.memory_space<vmem>>, vector<1x128xf32>
      %14 = vector.broadcast %13 : vector<1x128xf32> to vector<2x128xf32>
      %15 = arith.addf %12, %14 : vector<2x128xf32>
      %cst_14 = arith.constant dense<0xFF800000> : vector<2xf32>
      %16 = vector.multi_reduction <maximumf>, %15, %cst_14 [1] : vector<2x128xf32> to vector<2xf32>
      %17 = vector.shape_cast %16 : vector<2xf32> to vector<2x1xf32>
      %18 = vector.broadcast %17 : vector<2x1xf32> to vector<2x128xf32>
      %19 = arith.subf %15, %18 : vector<2x128xf32>
      %20 = math.exp %19 : vector<2x128xf32>
      %cst_15 = arith.constant dense<0.000000e+00> : vector<2xf32>
      %21 = vector.multi_reduction <add>, %20, %cst_15 [1] : vector<2x128xf32> to vector<2xf32>
      %22 = vector.shape_cast %21 : vector<2xf32> to vector<2x1xf32>
      %23 = tpu.reciprocal %22 : vector<2x1xf32> -> vector<2x1xf32>
      %24 = vector.broadcast %23 : vector<2x1xf32> to vector<2x128xf32>
      %25 = arith.mulf %20, %24 : vector<2x128xf32>
      %c0_16 = arith.constant 0 : index
      %c0_17 = arith.constant 0 : index
      %26 = vector.load %arg5[%c0_16, %c0_17] : memref<2x128xf32, #tpu.memory_space<vmem>>, vector<2x128xf32>
      tpu.vector_store %arg5[%c0_16, %c0_17], %25 {strides = array<i32>} : memref<2x128xf32, #tpu.memory_space<vmem>>, vector<2x128xf32>,
    } else {
    }
    return
  }
  func.func @transform_0(%arg0: i32, %arg1: i32) -> (i32, i32) {
    %c0_i32 = arith.constant 0 : i32
    return %arg0, %arg1 : i32, i32
  }
  func.func @transform_1(%arg0: i32, %arg1: i32) -> (i32, i32) {
    %c0_i32 = arith.constant 0 : i32
    %c0_i32_0 = arith.constant 0 : i32
    return %arg1, %c0_i32 : i32, i32
  }
  func.func @transform_2(%arg0: i32, %arg1: i32) -> (i32, i32) {
    %c0_i32 = arith.constant 0 : i32
    %c0_i32_0 = arith.constant 0 : i32
    %c0_i32_1 = arith.constant 0 : i32
    return %c0_i32, %c0_i32_0 : i32, i32
  }
  func.func @transform_3(%arg0: i32, %arg1: i32) -> (i32, i32) {
    %c0_i32 = arith.constant 0 : i32
    %c0_i32_0 = arith.constant 0 : i32
    return %arg0, %c0_i32 : i32, i32
  }
}

module attributes {stable_mosaic.version = 11 : i64} {
  func.func @_classifier_kernel(%arg0: i32, %arg1: i32, %arg2: memref<2x1024xf32, #tpu.memory_space<vmem>>, %arg3: memref<1024x128xf32, #tpu.memory_space<vmem>>, %arg4: memref<1x128xf32, #tpu.memory_space<vmem>>, %arg5: memref<2x128xf32, #tpu.memory_space<vmem>>, %arg6: memref<2x128xf32, #tpu.memory_space<vmem>>) attributes {dimension_semantics = [#tpu.dimension_semantics<parallel>, #tpu.dimension_semantics<arbitrary>], iteration_bounds = array<i64: 1, 1>, scalar_prefetch = 0 : i64, scratch_operands = 1 : i64, tpu.core_type = #tpu.core_type<tc>, window_params = [{transform_indices = @transform_0, window_bounds = array<i64: 2, 1024>}, {transform_indices = @transform_1, window_bounds = array<i64: 1024, 128>}, {pipeline_mode = #tpu.pipeline_mode<synchronous>, transform_indices = @transform_2, window_bounds = array<i64: 1, 128>}, {transform_indices = @transform_3, window_bounds = array<i64: 2, 128>}]} {
    %c0_i32 = arith.constant 0 : i32
    %0 = arith.cmpi eq, %arg1, %c0_i32 : i32
    %1 = arith.extui %0 : i1 to i32
    %c0_i32_0 = arith.constant 0 : i32
    %2 = arith.cmpi ne, %1, %c0_i32_0 : i32
    scf.if %2 {
      %cst_10 = arith.constant 0.000000e+00 : f32
      %12 = vector.broadcast %cst_10 : f32 to vector<2x128xf32>
      %c0_11 = arith.constant 0 : index
      %c0_12 = arith.constant 0 : index
      %13 = vector.load %arg6[%c0_11, %c0_12] : memref<2x128xf32, #tpu.memory_space<vmem>>, vector<2x128xf32>
      tpu.vector_store %arg6[%c0_11, %c0_12], %12 {strides = array<i32>} : memref<2x128xf32, #tpu.memory_space<vmem>>, vector<2x128xf32>,
    } else {
    }
    %c0 = arith.constant 0 : index
    %c0_1 = arith.constant 0 : index
    %3 = vector.load %arg6[%c0, %c0_1] : memref<2x128xf32, #tpu.memory_space<vmem>>, vector<2x128xf32>
    %c0_2 = arith.constant 0 : index
    %c0_3 = arith.constant 0 : index
    %4 = vector.load %arg2[%c0_2, %c0_3] : memref<2x1024xf32, #tpu.memory_space<vmem>>, vector<2x1024xf32>
    %c0_4 = arith.constant 0 : index
    %c0_5 = arith.constant 0 : index
    %5 = vector.load %arg3[%c0_4, %c0_5] : memref<1024x128xf32, #tpu.memory_space<vmem>>, vector<1024x128xf32>
    %cst = arith.constant dense<0.000000e+00> : vector<2x128xf32>
    %6 = tpu.matmul %4, %5, %cst {dimension_numbers = #tpu.dot_dimension_numbers<[1], [0], [0], [1], [0, 0, 1, 1], [], []>} : vector<2x1024xf32>, vector<1024x128xf32>, vector<2x128xf32> -> vector<2x128xf32>
    %7 = arith.addf %3, %6 : vector<2x128xf32>
    %c0_6 = arith.constant 0 : index
    %c0_7 = arith.constant 0 : index
    %8 = vector.load %arg6[%c0_6, %c0_7] : memref<2x128xf32, #tpu.memory_space<vmem>>, vector<2x128xf32>
    tpu.vector_store %arg6[%c0_6, %c0_7], %7 {strides = array<i32>} : memref<2x128xf32, #tpu.memory_space<vmem>>, vector<2x128xf32>,
    %c0_i32_8 = arith.constant 0 : i32
    %9 = arith.cmpi eq, %arg1, %c0_i32_8 : i32
    %10 = arith.extui %9 : i1 to i32
    %c0_i32_9 = arith.constant 0 : i32
    %11 = arith.cmpi ne, %10, %c0_i32_9 : i32
    scf.if %11 {
      %c0_10 = arith.constant 0 : index
      %c0_11 = arith.constant 0 : index
      %12 = vector.load %arg6[%c0_10, %c0_11] : memref<2x128xf32, #tpu.memory_space<vmem>>, vector<2x128xf32>
      %c0_12 = arith.constant 0 : index
      %c0_13 = arith.constant 0 : index
      %13 = vector.load %arg4[%c0_12, %c0_13] : memref<1x128xf32, #tpu.memory_space<vmem>>, vector<1x128xf32>
      %14 = vector.broadcast %13 : vector<1x128xf32> to vector<2x128xf32>
      %15 = arith.addf %12, %14 : vector<2x128xf32>
      %cst_14 = arith.constant dense<0xFF800000> : vector<2xf32>
      %16 = vector.multi_reduction <maximumf>, %15, %cst_14 [1] : vector<2x128xf32> to vector<2xf32>
      %17 = vector.shape_cast %16 : vector<2xf32> to vector<2x1xf32>
      %18 = vector.broadcast %17 : vector<2x1xf32> to vector<2x128xf32>
      %19 = arith.subf %15, %18 : vector<2x128xf32>
      %20 = math.exp %19 : vector<2x128xf32>
      %cst_15 = arith.constant dense<0.000000e+00> : vector<2xf32>
      %21 = vector.multi_reduction <add>, %20, %cst_15 [1] : vector<2x128xf32> to vector<2xf32>
      %22 = vector.shape_cast %21 : vector<2xf32> to vector<2x1xf32>
      %23 = tpu.reciprocal %22 : vector<2x1xf32> -> vector<2x1xf32>
      %24 = vector.broadcast %23 : vector<2x1xf32> to vector<2x128xf32>
      %25 = arith.mulf %20, %24 : vector<2x128xf32>
      %c0_16 = arith.constant 0 : index
      %c0_17 = arith.constant 0 : index
      %26 = vector.load %arg5[%c0_16, %c0_17] : memref<2x128xf32, #tpu.memory_space<vmem>>, vector<2x128xf32>
      tpu.vector_store %arg5[%c0_16, %c0_17], %25 {strides = array<i32>} : memref<2x128xf32, #tpu.memory_space<vmem>>, vector<2x128xf32>,
    } else {
    }
    return
  }
  func.func @transform_0(%arg0: i32, %arg1: i32) -> (i32, i32) {
    %c0_i32 = arith.constant 0 : i32
    return %arg0, %arg1 : i32, i32
  }
  func.func @transform_1(%arg0: i32, %arg1: i32) -> (i32, i32) {
    %c0_i32 = arith.constant 0 : i32
    %c0_i32_0 = arith.constant 0 : i32
    return %arg1, %c0_i32 : i32, i32
  }
  func.func @transform_2(%arg0: i32, %arg1: i32) -> (i32, i32) {
    %c0_i32 = arith.constant 0 : i32
    %c0_i32_0 = arith.constant 0 : i32
    %c0_i32_1 = arith.constant 0 : i32
    return %c0_i32, %c0_i32_0 : i32, i32
  }
  func.func @transform_3(%arg0: i32, %arg1: i32) -> (i32, i32) {
    %c0_i32 = arith.constant 0 : i32
    %c0_i32_0 = arith.constant 0 : i32
    return %arg0, %c0_i32 : i32, i32
  }
}

</mosaic_0001>

<bundles_post_ra>
// kernel: tpu_custom_call.1
= control target key start
LH: loop header
LB: loop body
LE: loop exit
PB: predicated region body
PF: predicated region fallthrough
CT: control target
= control target key end

     0   :  { %8 = vsyncpa [#allocation4], 0  ;;  %s544_s0 = inlined_call_operand.hbm [shape: f32[2,1024], index: 0, kind: input, shape index: {}]   ;;  %s545_s1 = inlined_call_operand.hbm [shape: f32[1024,128], index: 1, kind: input, shape index: {}]   ;;  %s546_s2 = inlined_call_operand.vmem [shape: f32[1,128], index: 2, kind: input, shape index: {}]   ;;  %s547_s3 = inlined_call_operand.hbm [shape: f32[2,128], index: 3, kind: output, shape index: {}]  }
   0x1   :  { %9 = vsyncpa [#allocation7], 0 }
   0x2   :  { %10 = vsyncpa [#allocation5], 0  ;;  %s16_s14 = sshll.u32 %s544_s0, 4  ;;  %s506_s15 = smov [#allocation3]   ;;  %s17_s14 = int_to_ptr.hbm [resolvable:$true] %s16_s14 }
   0x3   :  { %s18_s16 = sshll.u32 %s506_s15, 4  ;;  %s26_s19 = sshll.u32 %s545_s1, 4  ;;  %s19_s16 = int_to_ptr.vmem [resolvable:$true] %s18_s16  ;;  %s27_s19 = int_to_ptr.hbm [resolvable:$true] %s26_s19 }
   0x4   :  { %21 = dma.hbm_to_vmem [thread:$0]  %s17_s14, 256, %s19_s16, [#allocation4]  }
   0x5   :  { %s507_s20 = smov [#allocation6]   ;;  %s508_s22 = smov 128  }
   0x6   :  { %s28_s21 = sshll.u32 %s507_s20, 4  ;;  %s509_s23 = smov 8   ;;  %s29_s21 = int_to_ptr.vmem [resolvable:$true] %s28_s21 }
   0x7   :  { %34 = dma.hbm_to_vmem [thread:$0]  %s27_s19, 16384, %s29_s21, [#allocation7], %s508_s22, %s508_s22, %s509_s23  }
   0x8   :  { %500 = dma.done.wait [#allocation4], 256  }
   0x9   :  { %501 = vsyncadd [#allocation4], 4294967040 }
   0xa   :  { %502 = dma.done.wait [#allocation7], 16384  }
   0xb   :  { %503 = vsyncadd [#allocation7], 4294950912  ;;  %v68_v0 = vld [vmem:[#allocation6 + $0x78] sm:$0xff]  ;;  %v67_v2 = vld [vmem:[#allocation6 + $0x70] sm:$0xff]  ;;  %vm373_vm0 = vcmask 1041408   ;;  %s406_s27 = sshll.u32 %s547_s3, 4  ;;  %s407_s27 = int_to_ptr.hbm [resolvable:$true] %s406_s27 }
   0xc   :  { %v100_v1 = vld [vmem:[#allocation6 + $0x178] sm:$0xff]  ;;  %202 = vmatpush.msra.mxu0 %v68_v0  ;;  %v99_v4 = vld [vmem:[#allocation6 + $0x170] sm:$0xff]  ;;  %v66_v6 = vld [vmem:[#allocation6 + $0x68] sm:$0xff] }
   0xd   :  { %242 = vmatpush.msra.mxu2 %v100_v1  ;;  %v84_v3 = vld [vmem:[#allocation6 + $0xf8] sm:$0xff]  ;;  %v83_v7 = vld [vmem:[#allocation6 + $0xf0] sm:$0xff]  ;;  %v98_v8 = vld [vmem:[#allocation6 + $0x168] sm:$0xff] }
   0xe   :  { %v116_v5 = vld [vmem:[#allocation6 + $0x1f8] sm:$0xff]  ;;  %222 = vmatpush.msra.mxu1 %v84_v3  ;;  %203 = vmatpush.msra.mxu0 %v67_v2  ;;  %v115_v9 = vld [vmem:[#allocation6 + $0x1f0] sm:$0xff]  ;;  %v82_v10 = vld [vmem:[#allocation6 + $0xe8] sm:$0xff] }
   0xf   :  { %262 = vmatpush.msra.mxu3 %v116_v5  ;;  %243 = vmatpush.msra.mxu2 %v99_v4  ;;  %v65_v11 = vld [vmem:[#allocation6 + $0x60] sm:$0xff]  ;;  %v114_v13 = vld [vmem:[#allocation6 + $0x1e8] sm:$0xff]  ;;  %v64_v16 = vld [vmem:[#allocation6 + $0x58] sm:$0xff] }
  0x10   :  { %223 = vmatpush.msra.mxu1 %v83_v7  ;;  %v97_v12 = vld [vmem:[#allocation6 + $0x160] sm:$0xff]  ;;  %204 = vmatpush.msra.mxu0 %v66_v6  ;;  %v96_v17 = vld [vmem:[#allocation6 + $0x158] sm:$0xff]  ;;  %v63_v20 = vld [vmem:[#allocation6 + $0x50] sm:$0xff] }
  0x11   :  { %263 = vmatpush.msra.mxu3 %v115_v9  ;;  %244 = vmatpush.msra.mxu2 %v98_v8  ;;  %v81_v14 = vld [vmem:[#allocation6 + $0xe0] sm:$0xff]  ;;  %v80_v18 = vld [vmem:[#allocation6 + $0xd8] sm:$0xff]  ;;  %v95_v21 = vld [vmem:[#allocation6 + $0x150] sm:$0xff] }
  0x12   :  { %v113_v15 = vld [vmem:[#allocation6 + $0x1e0] sm:$0xff]  ;;  %224 = vmatpush.msra.mxu1 %v82_v10  ;;  %205 = vmatpush.msra.mxu0 %v65_v11  ;;  %v112_v19 = vld [vmem:[#allocation6 + $0x1d8] sm:$0xff]  ;;  %v79_v22 = vld [vmem:[#allocation6 + $0xd0] sm:$0xff] }
  0x13   :  { %264 = vmatpush.msra.mxu3 %v114_v13  ;;  %245 = vmatpush.msra.mxu2 %v97_v12  ;;  %v111_v23 = vld [vmem:[#allocation6 + $0x1d0] sm:$0xff]  ;;  %v62_v24 = vld [vmem:[#allocation6 + $0x48] sm:$0xff]  ;;  %v61_v28 = vld [vmem:[#allocation6 + $0x40] sm:$0xff] }
  0x14   :  { %225 = vmatpush.msra.mxu1 %v81_v14  ;;  %206 = vmatpush.msra.mxu0 %v64_v16  ;;  %v94_v25 = vld [vmem:[#allocation6 + $0x148] sm:$0xff]  ;;  %v93_v29 = vld [vmem:[#allocation6 + $0x140] sm:$0xff]  ;;  %v60_v32 = vld [vmem:[#allocation6 + $0x38] sm:$0xff] }
  0x15   :  { %265 = vmatpush.msra.mxu3 %v113_v15  ;;  %246 = vmatpush.msra.mxu2 %v96_v17  ;;  %v78_v26 = vld [vmem:[#allocation6 + $0xc8] sm:$0xff]  ;;  %v77_v30 = vld [vmem:[#allocation6 + $0xc0] sm:$0xff]  ;;  %v92_v33 = vld [vmem:[#allocation6 + $0x138] sm:$0xff] }
  0x16   :  { %226 = vmatpush.msra.mxu1 %v80_v18  ;;  %207 = vmatpush.msra.mxu0 %v63_v20  ;;  %v110_v27 = vld [vmem:[#allocation6 + $0x1c8] sm:$0xff]  ;;  %v109_v31 = vld [vmem:[#allocation6 + $0x1c0] sm:$0xff]  ;;  %v76_v34 = vld [vmem:[#allocation6 + $0xb8] sm:$0xff] }
  0x17   :  { %266 = vmatpush.msra.mxu3 %v112_v19  ;;  %247 = vmatpush.msra.mxu2 %v95_v21  ;;  %v108_v35 = vld [vmem:[#allocation6 + $0x1b8] sm:$0xff]  ;;  %v59_v36 = vld [vmem:[#allocation6 + $0x30] sm:$0xff]  ;;  %v58_v40 = vld [vmem:[#allocation6 + $0x28] sm:$0xff] }
  0x18   :  { %227 = vmatpush.msra.mxu1 %v79_v22  ;;  %208 = vmatpush.msra.mxu0 %v62_v24  ;;  %v91_v37 = vld [vmem:[#allocation6 + $0x130] sm:$0xff]  ;;  %v90_v41 = vld [vmem:[#allocation6 + $0x128] sm:$0xff]  ;;  %v57_v44 = vld [vmem:[#allocation6 + $0x20] sm:$0xff] }
  0x19   :  { %267 = vmatpush.msra.mxu3 %v111_v23  ;;  %248 = vmatpush.msra.mxu2 %v94_v25  ;;  %v75_v38 = vld [vmem:[#allocation6 + $0xb0] sm:$0xff]  ;;  %v74_v42 = vld [vmem:[#allocation6 + $0xa8] sm:$0xff]  ;;  %v89_v45 = vld [vmem:[#allocation6 + $0x120] sm:$0xff] }
  0x1a   :  { %228 = vmatpush.msra.mxu1 %v78_v26  ;;  %209 = vmatpush.msra.mxu0 %v61_v28  ;;  %v107_v39 = vld [vmem:[#allocation6 + $0x1b0] sm:$0xff]  ;;  %v106_v43 = vld [vmem:[#allocation6 + $0x1a8] sm:$0xff]  ;;  %v73_v46 = vld [vmem:[#allocation6 + $0xa0] sm:$0xff] }
  0x1b   :  { %268 = vmatpush.msra.mxu3 %v110_v27  ;;  %249 = vmatpush.msra.mxu2 %v93_v29  ;;  %v105_v47 = vld [vmem:[#allocation6 + $0x1a0] sm:$0xff]  ;;  %v56_v48 = vld [vmem:[#allocation6 + $0x18] sm:$0xff]  ;;  %v55_v52 = vld [vmem:[#allocation6 + $0x10] sm:$0xff] }
  0x1c   :  { %229 = vmatpush.msra.mxu1 %v77_v30  ;;  %210 = vmatpush.msra.mxu0 %v60_v32  ;;  %v88_v49 = vld [vmem:[#allocation6 + $0x118] sm:$0xff]  ;;  %v87_v53 = vld [vmem:[#allocation6 + $0x110] sm:$0xff]  ;;  %v54_v56 = vld [vmem:[#allocation6 + $0x8] sm:$0xff] }
  0x1d   :  { %269 = vmatpush.msra.mxu3 %v109_v31  ;;  %250 = vmatpush.msra.mxu2 %v92_v33  ;;  %v72_v50 = vld [vmem:[#allocation6 + $0x98] sm:$0xff]  ;;  %v71_v54 = vld [vmem:[#allocation6 + $0x90] sm:$0xff]  ;;  %v86_v57 = vld [vmem:[#allocation6 + $0x108] sm:$0xff] }
  0x1e   :  { %230 = vmatpush.msra.mxu1 %v76_v34  ;;  %211 = vmatpush.msra.mxu0 %v59_v36  ;;  %v104_v51 = vld [vmem:[#allocation6 + $0x198] sm:$0xff]  ;;  %v103_v55 = vld [vmem:[#allocation6 + $0x190] sm:$0xff]  ;;  %v70_v58 = vld [vmem:[#allocation6 + $0x88] sm:$0xff] }
  0x1f   :  { %270 = vmatpush.msra.mxu3 %v108_v35  ;;  %251 = vmatpush.msra.mxu2 %v91_v37  ;;  %v102_v59 = vld [vmem:[#allocation6 + $0x188] sm:$0xff]  ;;  %v53_v60 = vld [vmem:[#allocation6] sm:$0xff]  ;;  %v132_v62 = vld [vmem:[#allocation6 + $0x278] sm:$0xff] }
  0x20   :  { %231 = vmatpush.msra.mxu1 %v75_v38  ;;  %212 = vmatpush.msra.mxu0 %v58_v40  ;;  %v85_v61 = vld [vmem:[#allocation6 + $0x100] sm:$0xff]  ;;  %v164_v63 = vld [vmem:[#allocation6 + $0x378] sm:$0xff]  ;;  %v131_v2 = vld [vmem:[#allocation6 + $0x270] sm:$0xff] }
  0x21   :  { %271 = vmatpush.msra.mxu3 %v107_v39  ;;  %252 = vmatpush.msra.mxu2 %v90_v41  ;;  %v69_v0 = vld [vmem:[#allocation6 + $0x80] sm:$0xff]  ;;  %v148_v3 = vld [vmem:[#allocation6 + $0x2f8] sm:$0xff]  ;;  %v163_v4 = vld [vmem:[#allocation6 + $0x370] sm:$0xff] }
  0x22   :  { %232 = vmatpush.msra.mxu1 %v74_v42  ;;  %213 = vmatpush.msra.mxu0 %v57_v44  ;;  %v101_v1 = vld [vmem:[#allocation6 + $0x180] sm:$0xff]  ;;  %v180_v5 = vld [vmem:[#allocation6 + $0x3f8] sm:$0xff]  ;;  %v130_v6 = vld [vmem:[#allocation6 + $0x268] sm:$0xff] }
  0x23   :  { %272 = vmatpush.msra.mxu3 %v106_v43  ;;  %253 = vmatpush.msra.mxu2 %v89_v45  ;;  %v147_v7 = vld [vmem:[#allocation6 + $0x2f0] sm:$0xff]  ;;  %v162_v8 = vld [vmem:[#allocation6 + $0x368] sm:$0xff]  ;;  %v129_v10 = vld [vmem:[#allocation6 + $0x260] sm:$0xff] }
  0x24   :  { %233 = vmatpush.msra.mxu1 %v73_v46  ;;  %214 = vmatpush.msra.mxu0 %v56_v48  ;;  %v179_v9 = vld [vmem:[#allocation6 + $0x3f0] sm:$0xff]  ;;  %v146_v11 = vld [vmem:[#allocation6 + $0x2e8] sm:$0xff]  ;;  %v161_v13 = vld [vmem:[#allocation6 + $0x360] sm:$0xff] }
  0x25   :  { %273 = vmatpush.msra.mxu3 %v105_v47  ;;  %254 = vmatpush.msra.mxu2 %v88_v49  ;;  %v51_v12 = vld [vmem:[#allocation3] sm:$0xff]  ;;  %v178_v14 = vld [vmem:[#allocation6 + $0x3e8] sm:$0xff]  ;;  %v128_v15 = vld [vmem:[#allocation6 + $0x258] sm:$0xff] }
  0x26   :  { %234 = vmatpush.msra.mxu1 %v72_v50  ;;  %215 = vmatpush.msra.mxu0 %v55_v52  ;;  %183 = vst [vmem:[#allocation1] ss:$4 sm:$0xff] %v51_v12  ;;  %v145_v16 = vld [vmem:[#allocation6 + $0x2e0] sm:$0xff]  ;;  %v160_v17 = vld [vmem:[#allocation6 + $0x358] sm:$0xff]  ;;  %v127_v19 = vld [vmem:[#allocation6 + $0x250] sm:$0xff] }
  0x27   :  { %274 = vmatpush.msra.mxu3 %v104_v51  ;;  %255 = vmatpush.msra.mxu2 %v87_v53  ;;  %v177_v18 = vld [vmem:[#allocation6 + $0x3e0] sm:$0xff]  ;;  %v144_v20 = vld [vmem:[#allocation6 + $0x2d8] sm:$0xff]  ;;  %v159_v21 = vld [vmem:[#allocation6 + $0x350] sm:$0xff] }
  0x28   :  { %235 = vmatpush.msra.mxu1 %v71_v54  ;;  %216 = vmatpush.msra.mxu0 %v54_v56  ;;  %v176_v22 = vld [vmem:[#allocation6 + $0x3d8] sm:$0xff]  ;;  %v126_v23 = vld [vmem:[#allocation6 + $0x248] sm:$0xff]  ;;  %v143_v24 = vld [vmem:[#allocation6 + $0x2d0] sm:$0xff] }
  0x29   :  { %275 = vmatpush.msra.mxu3 %v103_v55  ;;  %256 = vmatpush.msra.mxu2 %v86_v57  ;;  %v158_v25 = vld [vmem:[#allocation6 + $0x348] sm:$0xff]  ;;  %v175_v26 = vld [vmem:[#allocation6 + $0x3d0] sm:$0xff]  ;;  %v52_v27 = vld [vmem:[#allocation3 + $0x8] sm:$0xff] }
  0x2a   :  { %236 = vmatpush.msra.mxu1 %v70_v58  ;;  %217 = vmatpush.msra.mxu0 %v53_v60  ;;  %v125_v28 = vld [vmem:[#allocation6 + $0x240] sm:$0xff]  ;;  %v142_v29 = vld [vmem:[#allocation6 + $0x2c8] sm:$0xff]  ;;  %v124_v32 = vld [vmem:[#allocation6 + $0x238] sm:$0xff]  ;;  %185 = vst [vmem:[#allocation1 + $0x20] ss:$4 sm:$0xff] %v52_v27 }
  0x2b   :  { %276 = vmatpush.msra.mxu3 %v102_v59  ;;  %257 = vmatpush.msra.mxu2 %v85_v61  ;;  %v157_v30 = vld [vmem:[#allocation6 + $0x340] sm:$0xff]  ;;  %v174_v31 = vld [vmem:[#allocation6 + $0x3c8] sm:$0xff]  ;;  %v156_v34 = vld [vmem:[#allocation6 + $0x338] sm:$0xff] }
  0x2c   :  { %282 = vmatpush.msrb.mxu0 %v132_v62  ;;  %237 = vmatpush.msra.mxu1 %v69_v0  ;;  %v141_v33 = vld [vmem:[#allocation6 + $0x2c0] sm:$0xff]  ;;  %v123_v36 = vld [vmem:[#allocation6 + $0x230] sm:$0xff]  ;;  %v140_v37 = vld [vmem:[#allocation6 + $0x2b8] sm:$0xff] }
  0x2d   :  { %322 = vmatpush.msrb.mxu2 %v164_v63  ;;  %277 = vmatpush.msra.mxu3 %v101_v1  ;;  %v173_v35 = vld [vmem:[#allocation6 + $0x3c0] sm:$0xff]  ;;  %v155_v38 = vld [vmem:[#allocation6 + $0x330] sm:$0xff]  ;;  %v172_v39 = vld [vmem:[#allocation6 + $0x3b8] sm:$0xff] }
  0x2e   :  { %283 = vmatpush.msrb.mxu0 %v131_v2  ;;  %302 = vmatpush.msrb.mxu1 %v148_v3  ;;  %v122_v40 = vld [vmem:[#allocation6 + $0x228] sm:$0xff]  ;;  %v139_v41 = vld [vmem:[#allocation6 + $0x2b0] sm:$0xff]  ;;  %v121_v45 = vld [vmem:[#allocation6 + $0x220] sm:$0xff] }
  0x2f   :  { %323 = vmatpush.msrb.mxu2 %v163_v4  ;;  %342 = vmatpush.msrb.mxu3 %v180_v5  ;;  %v154_v42 = vld [vmem:[#allocation6 + $0x328] sm:$0xff]  ;;  %v171_v43 = vld [vmem:[#allocation6 + $0x3b0] sm:$0xff]  ;;  %v153_v47 = vld [vmem:[#allocation6 + $0x320] sm:$0xff] }
  0x30   :  { %284 = vmatpush.msrb.mxu0 %v130_v6  ;;  %303 = vmatpush.msrb.mxu1 %v147_v7  ;;  %v188_v44 = vld.sshfl [vmem:[#allocation1 + $0x10] sm:$0xff pattern:$0x73625140]  ;;  %v138_v46 = vld [vmem:[#allocation6 + $0x2a8] sm:$0xff]  ;;  %v137_v52 = vld [vmem:[#allocation6 + $0x2a0] sm:$0xff] }
  0x31   :  { %324 = vmatpush.msrb.mxu2 %v162_v8  ;;  %343 = vmatpush.msrb.mxu3 %v179_v9  ;;  %v170_v48 = vld [vmem:[#allocation6 + $0x3a8] sm:$0xff]  ;;  %v189_v50 = vld.sshfl [vmem:[#allocation1 + $0x18] sm:$0xff pattern:$0x73625140]  ;;  %v119_v56 = vld [vmem:[#allocation6 + $0x210] sm:$0xff] }
  0x32   :  { %285 = vmatpush.msrb.mxu0 %v129_v10  ;;  %304 = vmatpush.msrb.mxu1 %v146_v11  ;;  %v186_v49 = vld.sshfl [vmem:[#allocation1] sm:$0xff pattern:$0x73625140]  ;;  %v120_v51 = vld [vmem:[#allocation6 + $0x218] sm:$0xff]  ;;  %v151_v58 = vld [vmem:[#allocation6 + $0x310] sm:$0xff]  ;;  %v510_v10 = vmov 0.0  }
  0x33   :  { %325 = vmatpush.msrb.mxu2 %v161_v13  ;;  %344 = vmatpush.msrb.mxu3 %v178_v14  ;;  %v152_v53 = vld [vmem:[#allocation6 + $0x318] sm:$0xff]  ;;  %v169_v54 = vld [vmem:[#allocation6 + $0x3a0] sm:$0xff]  ;;  %v187_v55 = vld.sshfl [vmem:[#allocation1 + $0x8] sm:$0xff pattern:$0x73625140] }
  0x34   :  { %286 = vmatpush.msrb.mxu0 %v128_v15  ;;  %305 = vmatpush.msrb.mxu1 %v145_v16  ;;  %v136_v57 = vld [vmem:[#allocation6 + $0x298] sm:$0xff]  ;;  %v118_v60 = vld [vmem:[#allocation6 + $0x208] sm:$0xff]  ;;  %v135_v61 = vld [vmem:[#allocation6 + $0x290] sm:$0xff]  ;;  %49 = vst [vmem:[#allocation2] sm:$0x3] %v510_v10 }
  0x35   :  { %326 = vmatpush.msrb.mxu2 %v160_v17  ;;  %345 = vmatpush.msrb.mxu3 %v177_v18  ;;  %v168_v59 = vld [vmem:[#allocation6 + $0x398] sm:$0xff]  ;;  %v150_v62 = vld [vmem:[#allocation6 + $0x308] sm:$0xff]  ;;  %v167_v63 = vld [vmem:[#allocation6 + $0x390] sm:$0xff] }
  0x36   :  { %287 = vmatpush.msrb.mxu0 %v127_v19  ;;  %306 = vmatpush.msrb.mxu1 %v144_v20  ;;  %v117_v0 = vld [vmem:[#allocation6 + $0x200] sm:$0xff]  ;;  %v134_v1 = vld [vmem:[#allocation6 + $0x288] sm:$0xff]  ;;  %v192_v5 = vld.sshfl [vmem:[#allocation1 + $0x30] sm:$0xff pattern:$0x73625140] }
  0x37   :  { %327 = vmatpush.msrb.mxu2 %v159_v21  ;;  %346 = vmatpush.msrb.mxu3 %v176_v22  ;;  %v149_v2 = vld [vmem:[#allocation6 + $0x300] sm:$0xff]  ;;  %v166_v3 = vld [vmem:[#allocation6 + $0x388] sm:$0xff] }
  0x38   :  { %288 = vmatpush.msrb.mxu0 %v126_v23  ;;  %307 = vmatpush.msrb.mxu1 %v143_v24  ;;  %v190_v4 = vld.sshfl [vmem:[#allocation1 + $0x20] sm:$0xff pattern:$0x73625140]  ;;  %v191_v8 = vld.sshfl [vmem:[#allocation1 + $0x28] sm:$0xff pattern:$0x73625140] }
  0x39   :  { %328 = vmatpush.msrb.mxu2 %v158_v25  ;;  %347 = vmatpush.msrb.mxu3 %v175_v26  ;;  %v133_v6 = vld [vmem:[#allocation6 + $0x280] sm:$0xff] }
  0x3a   :  { %289 = vmatpush.msrb.mxu0 %v125_v28  ;;  %308 = vmatpush.msrb.mxu1 %v142_v29  ;;  %v165_v7 = vld [vmem:[#allocation6 + $0x380] sm:$0xff] }
  0x3b   :  { %329 = vmatpush.msrb.mxu2 %v157_v30  ;;  %348 = vmatpush.msrb.mxu3 %v174_v31  ;;  %v193_v9 = vld.sshfl [vmem:[#allocation1 + $0x38] sm:$0xff pattern:$0x73625140]  ;;  %v50_v24 = vld [vmem:[#allocation2] sm:$0x3] }
  0x3c   :  { %290 = vmatpush.msrb.mxu0 %v124_v32  ;;  %309 = vmatpush.msrb.mxu1 %v141_v33  ;;  %v423_v28 = vld [vmem:[%s546_s2] ss:$0 sm:$0xff]  ;;  %s511_s2 = smov [#allocation8]  }
  0x3d   :  { %330 = vmatpush.msrb.mxu2 %v156_v34  ;;  %349 = vmatpush.msrb.mxu3 %v173_v35  ;;  %s404_s24 = sshll.u32 %s511_s2, 4  ;;  %s405_s24 = int_to_ptr.vmem [resolvable:$true] %s404_s24 }
  0x3e   :  { %291 = vmatpush.msrb.mxu0 %v123_v36  ;;  %310 = vmatpush.msrb.mxu1 %v140_v37 }
  0x3f   :  { %331 = vmatpush.msrb.mxu2 %v155_v38  ;;  %350 = vmatpush.msrb.mxu3 %v172_v39 }
  0x40   :  { %292 = vmatpush.msrb.mxu0 %v122_v40  ;;  %311 = vmatpush.msrb.mxu1 %v139_v41 }
  0x41   :  { %332 = vmatpush.msrb.mxu2 %v154_v42  ;;  %351 = vmatpush.msrb.mxu3 %v171_v43 }
  0x42   :  { %258 = vmatmul.f32.vlgmr.msra.gmra.mxu2 %v188_v44  ;;  %293 = vmatpush.msrb.mxu0 %v121_v45 }
  0x43   :  { %312 = vmatpush.msrb.mxu1 %v138_v46  ;;  %333 = vmatpush.msrb.mxu2 %v153_v47 }
  0x44   :  { %352 = vmatpush.msrb.mxu3 %v170_v48  ;;  %218 = vmatmul.f32.vlgmr.msra.gmra.mxu0 %v186_v49 }
  0x45   :  { %278 = vmatmul.f32.vlgmr.msra.gmra.mxu3 %v189_v50  ;;  %294 = vmatpush.msrb.mxu0 %v120_v51 }
  0x46   :  { %313 = vmatpush.msrb.mxu1 %v137_v52  ;;  %334 = vmatpush.msrb.mxu2 %v152_v53 }
  0x47   :  { %353 = vmatpush.msrb.mxu3 %v169_v54  ;;  %238 = vmatmul.f32.vlgmr.msra.gmra.mxu1 %v187_v55 }
  0x48   :  { %295 = vmatpush.msrb.mxu0 %v119_v56  ;;  %314 = vmatpush.msrb.mxu1 %v136_v57 }
  0x49   :  { %335 = vmatpush.msrb.mxu2 %v151_v58  ;;  %354 = vmatpush.msrb.mxu3 %v168_v59 }
  0x4a   :  { %296 = vmatpush.msrb.mxu0 %v118_v60  ;;  %315 = vmatpush.msrb.mxu1 %v135_v61 }
  0x4b   :  { %336 = vmatpush.msrb.mxu2 %v150_v62  ;;  %355 = vmatpush.msrb.mxu3 %v167_v63 }
  0x4c   :  { %297 = vmatpush.msrb.mxu0 %v117_v0  ;;  %316 = vmatpush.msrb.mxu1 %v134_v1 }
  0x4d   :  { %337 = vmatpush.msrb.mxu2 %v149_v2  ;;  %356 = vmatpush.msrb.mxu3 %v166_v3 }
  0x4e   :  { %298 = vmatmul.f32.vlgmr.msrb.gmra.mxu0 %v190_v4  ;;  %338 = vmatmul.f32.vlgmr.msrb.gmra.mxu2 %v192_v5 }
  0x4f   :  { %317 = vmatpush.msrb.mxu1 %v133_v6  ;;  %357 = vmatpush.msrb.mxu3 %v165_v7 }
  0x50   :  { %318 = vmatmul.f32.vlgmr.msrb.gmra.mxu1 %v191_v8  ;;  %358 = vmatmul.f32.vlgmr.msrb.gmra.mxu3 %v193_v9 }
  0xc1   :  { %v219_v11 = vpop.f32.mrf.mxu0 }
  0xc4   :  { %v239_v12 = vpop.f32.mrf.mxu1 }
  0xc5   :  { %v240_v13 = vadd.f32 %v239_v12, %v219_v11  ;;  %v259_v14 = vpop.f32.mrf.mxu2 }
  0xc7   :  { %v260_v15 = vadd.f32 %v259_v14, %v240_v13 }
  0xc8   :  { %v279_v16 = vpop.f32.mrf.mxu3 }
  0xc9   :  { %v280_v17 = vadd.f32 %v279_v16, %v260_v15 }
  0xcb   :  { %v299_v18 = vpop.f32.mrf.mxu0 }
  0xcc   :  { %v300_v19 = vadd.f32 %v299_v18, %v280_v17 }
  0xcd   :  { %v319_v20 = vpop.f32.mrf.mxu1 }
  0xce   :  { %v320_v21 = vadd.f32 %v319_v20, %v300_v19 }
  0xd1   :  { %v339_v22 = vpop.f32.mrf.mxu2 }
  0xd2   :  { %v340_v23 = vadd.f32 %v339_v22, %v320_v21 }
  0xd3   :  { %v359_v25 = vpop.f32.mrf.mxu3 }
  0xd4   :  { %v360_v26 = vadd.f32 %v359_v25, %v340_v23 }
  0xd6   :  { %v362_v27 = vadd.f32 %v360_v26, %v50_v24 }
  0xd8   :  { %363 = vst [vmem:[#allocation2] sm:$0x3] %v362_v27 }
  0xdf   :  { %v367_v29 = vld [vmem:[#allocation2] sm:$0x3] }
  0xe0   :  { %v372_v30 = vadd.f32 %v423_v28, %v367_v29 }
  0xe2   :  { %v374_v31 = vsel %vm373_vm0, %v372_v30, -inf }
  0xe3   :  { %375 = vmax.xlane.f32.xlu0 %v374_v31 }
 0x156   :  { %v376_v32 = vpop.xlane.xlu0 %375 }
 0x157   :  { %v377_v33 = vsub.f32 %v372_v30, %v376_v32 }
 0x159   :  { %v378_v34 = vmul.f32 1.442695, %v377_v33 }
 0x15b   :  { %424 = vpow2.f32 %v378_v34 }
 0x161   :  { %v425_v35 = vpop.eup %424 }
 0x162   :  { %v380_v36 = vsel %vm373_vm0, %v425_v35, 0.0 }
 0x163   :  { %381 = vadd.xlane.f32.xlu0 %v380_v36 }
 0x1d6   :  { %v382_v37 = vpop.xlane.xlu0 %381 }
 0x1d7   :  { %426 = vrcp.f32 %v382_v37  ;;  %v394_v41 = vand.u32 2147483648, %v382_v37  ;;  %v392_v43 = vand.u32 2147483647, %v382_v37  ;;  %vm388_vm2 = vweird.f32 %v382_v37 }
 0x1d9   :  { %v395_v45 = vor.u32 1.1754944e-38, %v394_v41  ;;  %vm393_vm4 = vcmp.eq.f32.partialorder %v392_v43, 8.507059e+37 }
 0x1dd   :  { %v427_v38 = vpop.eup %426 }
 0x1de   :  { %v384_v39 = vmul.f32 %v427_v38, %v382_v37  ;;  %vm389_vm1 = vweird.f32 %v427_v38 }
 0x1df   :  { %vm390_vm3 = vmor %vm388_vm2, %vm389_vm1 }
 0x1e0   :  { %v385_v40 = vsub.f32 1.0, %v384_v39 }
 0x1e2   :  { %v386_v42 = vmul.f32 %v427_v38, %v385_v40 }
 0x1e4   :  { %v387_v44 = vadd.f32 %v427_v38, %v386_v42 }
 0x1e6   :  { %v391_v46 = vsel %vm390_vm3, %v427_v38, %v387_v44 }
 0x1e7   :  { %v396_v47 = vsel %vm393_vm4, %v395_v45, %v391_v46 }
 0x1e8   :  { %v397_v48 = vmul.f32 %v425_v35, %v396_v47 }
 0x1ea   :  { %398 = vst [vmem:[#allocation8] sm:$0x3] %v397_v48 }
 0x1eb   :  { %409 = dma.vmem_to_hbm [thread:$0]  %s405_s24, 32, %s407_s27, [#allocation5]  }
 0x1ec   :  { %504 = dma.done.wait [#allocation5], 32  }
 0x1ed   :  { %505 = vsyncadd [#allocation5], 4294967264 }
 0x1ee   :  { %414 = vsyncpa [#allocation4], 1 }
 0x1ef   :  { %415 = vsyncpa [#allocation7], 1 }
 0x1f0   :  { %416 = vsyncpa [#allocation5], 1 }

// kernel: tpu_custom_call.1
= control target key start
LH: loop header
LB: loop body
LE: loop exit
PB: predicated region body
PF: predicated region fallthrough
CT: control target
= control target key end

     0   :  { %8 = vsyncpa [#allocation4], 0  ;;  %s544_s0 = inlined_call_operand.hbm [shape: f32[2,1024], index: 0, kind: input, shape index: {}]   ;;  %s545_s1 = inlined_call_operand.hbm [shape: f32[1024,128], index: 1, kind: input, shape index: {}]   ;;  %s546_s2 = inlined_call_operand.vmem [shape: f32[1,128], index: 2, kind: input, shape index: {}]   ;;  %s547_s3 = inlined_call_operand.hbm [shape: f32[2,128], index: 3, kind: output, shape index: {}]  }
   0x1   :  { %9 = vsyncpa [#allocation7], 0 }
   0x2   :  { %10 = vsyncpa [#allocation5], 0  ;;  %s16_s14 = sshll.u32 %s544_s0, 4  ;;  %s506_s15 = smov [#allocation3]   ;;  %s17_s14 = int_to_ptr.hbm [resolvable:$true] %s16_s14 }
   0x3   :  { %s18_s16 = sshll.u32 %s506_s15, 4  ;;  %s26_s19 = sshll.u32 %s545_s1, 4  ;;  %s19_s16 = int_to_ptr.vmem [resolvable:$true] %s18_s16  ;;  %s27_s19 = int_to_ptr.hbm [resolvable:$true] %s26_s19 }
   0x4   :  { %21 = dma.hbm_to_vmem [thread:$0]  %s17_s14, 256, %s19_s16, [#allocation4]  }
   0x5   :  { %s507_s20 = smov [#allocation6]   ;;  %s508_s22 = smov 128  }
   0x6   :  { %s28_s21 = sshll.u32 %s507_s20, 4  ;;  %s509_s23 = smov 8   ;;  %s29_s21 = int_to_ptr.vmem [resolvable:$true] %s28_s21 }
   0x7   :  { %34 = dma.hbm_to_vmem [thread:$0]  %s27_s19, 16384, %s29_s21, [#allocation7], %s508_s22, %s508_s22, %s509_s23  }
   0x8   :  { %500 = dma.done.wait [#allocation4], 256  }
   0x9   :  { %501 = vsyncadd [#allocation4], 4294967040 }
   0xa   :  { %502 = dma.done.wait [#allocation7], 16384  }
   0xb   :  { %503 = vsyncadd [#allocation7], 4294950912  ;;  %v68_v0 = vld [vmem:[#allocation6 + $0x78] sm:$0xff]  ;;  %v67_v2 = vld [vmem:[#allocation6 + $0x70] sm:$0xff]  ;;  %vm373_vm0 = vcmask 1041408   ;;  %s406_s27 = sshll.u32 %s547_s3, 4  ;;  %s407_s27 = int_to_ptr.hbm [resolvable:$true] %s406_s27 }
   0xc   :  { %v100_v1 = vld [vmem:[#allocation6 + $0x178] sm:$0xff]  ;;  %202 = vmatpush.msra.mxu0 %v68_v0  ;;  %v99_v4 = vld [vmem:[#allocation6 + $0x170] sm:$0xff]  ;;  %v66_v6 = vld [vmem:[#allocation6 + $0x68] sm:$0xff] }
   0xd   :  { %242 = vmatpush.msra.mxu2 %v100_v1  ;;  %v84_v3 = vld [vmem:[#allocation6 + $0xf8] sm:$0xff]  ;;  %v83_v7 = vld [vmem:[#allocation6 + $0xf0] sm:$0xff]  ;;  %v98_v8 = vld [vmem:[#allocation6 + $0x168] sm:$0xff] }
   0xe   :  { %v116_v5 = vld [vmem:[#allocation6 + $0x1f8] sm:$0xff]  ;;  %222 = vmatpush.msra.mxu1 %v84_v3  ;;  %203 = vmatpush.msra.mxu0 %v67_v2  ;;  %v115_v9 = vld [vmem:[#allocation6 + $0x1f0] sm:$0xff]  ;;  %v82_v10 = vld [vmem:[#allocation6 + $0xe8] sm:$0xff] }
   0xf   :  { %262 = vmatpush.msra.mxu3 %v116_v5  ;;  %243 = vmatpush.msra.mxu2 %v99_v4  ;;  %v65_v11 = vld [vmem:[#allocation6 + $0x60] sm:$0xff]  ;;  %v114_v13 = vld [vmem:[#allocation6 + $0x1e8] sm:$0xff]  ;;  %v64_v16 = vld [vmem:[#allocation6 + $0x58] sm:$0xff] }
  0x10   :  { %223 = vmatpush.msra.mxu1 %v83_v7  ;;  %v97_v12 = vld [vmem:[#allocation6 + $0x160] sm:$0xff]  ;;  %204 = vmatpush.msra.mxu0 %v66_v6  ;;  %v96_v17 = vld [vmem:[#allocation6 + $0x158] sm:$0xff]  ;;  %v63_v20 = vld [vmem:[#allocation6 + $0x50] sm:$0xff] }
  0x11   :  { %263 = vmatpush.msra.mxu3 %v115_v9  ;;  %244 = vmatpush.msra.mxu2 %v98_v8  ;;  %v81_v14 = vld [vmem:[#allocation6 + $0xe0] sm:$0xff]  ;;  %v80_v18 = vld [vmem:[#allocation6 + $0xd8] sm:$0xff]  ;;  %v95_v21 = vld [vmem:[#allocation6 + $0x150] sm:$0xff] }
  0x12   :  { %v113_v15 = vld [vmem:[#allocation6 + $0x1e0] sm:$0xff]  ;;  %224 = vmatpush.msra.mxu1 %v82_v10  ;;  %205 = vmatpush.msra.mxu0 %v65_v11  ;;  %v112_v19 = vld [vmem:[#allocation6 + $0x1d8] sm:$0xff]  ;;  %v79_v22 = vld [vmem:[#allocation6 + $0xd0] sm:$0xff] }
  0x13   :  { %264 = vmatpush.msra.mxu3 %v114_v13  ;;  %245 = vmatpush.msra.mxu2 %v97_v12  ;;  %v111_v23 = vld [vmem:[#allocation6 + $0x1d0] sm:$0xff]  ;;  %v62_v24 = vld [vmem:[#allocation6 + $0x48] sm:$0xff]  ;;  %v61_v28 = vld [vmem:[#allocation6 + $0x40] sm:$0xff] }
  0x14   :  { %225 = vmatpush.msra.mxu1 %v81_v14  ;;  %206 = vmatpush.msra.mxu0 %v64_v16  ;;  %v94_v25 = vld [vmem:[#allocation6 + $0x148] sm:$0xff]  ;;  %v93_v29 = vld [vmem:[#allocation6 + $0x140] sm:$0xff]  ;;  %v60_v32 = vld [vmem:[#allocation6 + $0x38] sm:$0xff] }
  0x15   :  { %265 = vmatpush.msra.mxu3 %v113_v15  ;;  %246 = vmatpush.msra.mxu2 %v96_v17  ;;  %v78_v26 = vld [vmem:[#allocation6 + $0xc8] sm:$0xff]  ;;  %v77_v30 = vld [vmem:[#allocation6 + $0xc0] sm:$0xff]  ;;  %v92_v33 = vld [vmem:[#allocation6 + $0x138] sm:$0xff] }
  0x16   :  { %226 = vmatpush.msra.mxu1 %v80_v18  ;;  %207 = vmatpush.msra.mxu0 %v63_v20  ;;  %v110_v27 = vld [vmem:[#allocation6 + $0x1c8] sm:$0xff]  ;;  %v109_v31 = vld [vmem:[#allocation6 + $0x1c0] sm:$0xff]  ;;  %v76_v34 = vld [vmem:[#allocation6 + $0xb8] sm:$0xff] }
  0x17   :  { %266 = vmatpush.msra.mxu3 %v112_v19  ;;  %247 = vmatpush.msra.mxu2 %v95_v21  ;;  %v108_v35 = vld [vmem:[#allocation6 + $0x1b8] sm:$0xff]  ;;  %v59_v36 = vld [vmem:[#allocation6 + $0x30] sm:$0xff]  ;;  %v58_v40 = vld [vmem:[#allocation6 + $0x28] sm:$0xff] }
  0x18   :  { %227 = vmatpush.msra.mxu1 %v79_v22  ;;  %208 = vmatpush.msra.mxu0 %v62_v24  ;;  %v91_v37 = vld [vmem:[#allocation6 + $0x130] sm:$0xff]  ;;  %v90_v41 = vld [vmem:[#allocation6 + $0x128] sm:$0xff]  ;;  %v57_v44 = vld [vmem:[#allocation6 + $0x20] sm:$0xff] }
  0x19   :  { %267 = vmatpush.msra.mxu3 %v111_v23  ;;  %248 = vmatpush.msra.mxu2 %v94_v25  ;;  %v75_v38 = vld [vmem:[#allocation6 + $0xb0] sm:$0xff]  ;;  %v74_v42 = vld [vmem:[#allocation6 + $0xa8] sm:$0xff]  ;;  %v89_v45 = vld [vmem:[#allocation6 + $0x120] sm:$0xff] }
  0x1a   :  { %228 = vmatpush.msra.mxu1 %v78_v26  ;;  %209 = vmatpush.msra.mxu0 %v61_v28  ;;  %v107_v39 = vld [vmem:[#allocation6 + $0x1b0] sm:$0xff]  ;;  %v106_v43 = vld [vmem:[#allocation6 + $0x1a8] sm:$0xff]  ;;  %v73_v46 = vld [vmem:[#allocation6 + $0xa0] sm:$0xff] }
  0x1b   :  { %268 = vmatpush.msra.mxu3 %v110_v27  ;;  %249 = vmatpush.msra.mxu2 %v93_v29  ;;  %v105_v47 = vld [vmem:[#allocation6 + $0x1a0] sm:$0xff]  ;;  %v56_v48 = vld [vmem:[#allocation6 + $0x18] sm:$0xff]  ;;  %v55_v52 = vld [vmem:[#allocation6 + $0x10] sm:$0xff] }
  0x1c   :  { %229 = vmatpush.msra.mxu1 %v77_v30  ;;  %210 = vmatpush.msra.mxu0 %v60_v32  ;;  %v88_v49 = vld [vmem:[#allocation6 + $0x118] sm:$0xff]  ;;  %v87_v53 = vld [vmem:[#allocation6 + $0x110] sm:$0xff]  ;;  %v54_v56 = vld [vmem:[#allocation6 + $0x8] sm:$0xff] }
  0x1d   :  { %269 = vmatpush.msra.mxu3 %v109_v31  ;;  %250 = vmatpush.msra.mxu2 %v92_v33  ;;  %v72_v50 = vld [vmem:[#allocation6 + $0x98] sm:$0xff]  ;;  %v71_v54 = vld [vmem:[#allocation6 + $0x90] sm:$0xff]  ;;  %v86_v57 = vld [vmem:[#allocation6 + $0x108] sm:$0xff] }
  0x1e   :  { %230 = vmatpush.msra.mxu1 %v76_v34  ;;  %211 = vmatpush.msra.mxu0 %v59_v36  ;;  %v104_v51 = vld [vmem:[#allocation6 + $0x198] sm:$0xff]  ;;  %v103_v55 = vld [vmem:[#allocation6 + $0x190] sm:$0xff]  ;;  %v70_v58 = vld [vmem:[#allocation6 + $0x88] sm:$0xff] }
  0x1f   :  { %270 = vmatpush.msra.mxu3 %v108_v35  ;;  %251 = vmatpush.msra.mxu2 %v91_v37  ;;  %v102_v59 = vld [vmem:[#allocation6 + $0x188] sm:$0xff]  ;;  %v53_v60 = vld [vmem:[#allocation6] sm:$0xff]  ;;  %v132_v62 = vld [vmem:[#allocation6 + $0x278] sm:$0xff] }
  0x20   :  { %231 = vmatpush.msra.mxu1 %v75_v38  ;;  %212 = vmatpush.msra.mxu0 %v58_v40  ;;  %v85_v61 = vld [vmem:[#allocation6 + $0x100] sm:$0xff]  ;;  %v164_v63 = vld [vmem:[#allocation6 + $0x378] sm:$0xff]  ;;  %v131_v2 = vld [vmem:[#allocation6 + $0x270] sm:$0xff] }
  0x21   :  { %271 = vmatpush.msra.mxu3 %v107_v39  ;;  %252 = vmatpush.msra.mxu2 %v90_v41  ;;  %v69_v0 = vld [vmem:[#allocation6 + $0x80] sm:$0xff]  ;;  %v148_v3 = vld [vmem:[#allocation6 + $0x2f8] sm:$0xff]  ;;  %v163_v4 = vld [vmem:[#allocation6 + $0x370] sm:$0xff] }
  0x22   :  { %232 = vmatpush.msra.mxu1 %v74_v42  ;;  %213 = vmatpush.msra.mxu0 %v57_v44  ;;  %v101_v1 = vld [vmem:[#allocation6 + $0x180] sm:$0xff]  ;;  %v180_v5 = vld [vmem:[#allocation6 + $0x3f8] sm:$0xff]  ;;  %v130_v6 = vld [vmem:[#allocation6 + $0x268] sm:$0xff] }
  0x23   :  { %272 = vmatpush.msra.mxu3 %v106_v43  ;;  %253 = vmatpush.msra.mxu2 %v89_v45  ;;  %v147_v7 = vld [vmem:[#allocation6 + $0x2f0] sm:$0xff]  ;;  %v162_v8 = vld [vmem:[#allocation6 + $0x368] sm:$0xff]  ;;  %v129_v10 = vld [vmem:[#allocation6 + $0x260] sm:$0xff] }
  0x24   :  { %233 = vmatpush.msra.mxu1 %v73_v46  ;;  %214 = vmatpush.msra.mxu0 %v56_v48  ;;  %v179_v9 = vld [vmem:[#allocation6 + $0x3f0] sm:$0xff]  ;;  %v146_v11 = vld [vmem:[#allocation6 + $0x2e8] sm:$0xff]  ;;  %v161_v13 = vld [vmem:[#allocation6 + $0x360] sm:$0xff] }
  0x25   :  { %273 = vmatpush.msra.mxu3 %v105_v47  ;;  %254 = vmatpush.msra.mxu2 %v88_v49  ;;  %v51_v12 = vld [vmem:[#allocation3] sm:$0xff]  ;;  %v178_v14 = vld [vmem:[#allocation6 + $0x3e8] sm:$0xff]  ;;  %v128_v15 = vld [vmem:[#allocation6 + $0x258] sm:$0xff] }
  0x26   :  { %234 = vmatpush.msra.mxu1 %v72_v50  ;;  %215 = vmatpush.msra.mxu0 %v55_v52  ;;  %183 = vst [vmem:[#allocation1] ss:$4 sm:$0xff] %v51_v12  ;;  %v145_v16 = vld [vmem:[#allocation6 + $0x2e0] sm:$0xff]  ;;  %v160_v17 = vld [vmem:[#allocation6 + $0x358] sm:$0xff]  ;;  %v127_v19 = vld [vmem:[#allocation6 + $0x250] sm:$0xff] }
  0x27   :  { %274 = vmatpush.msra.mxu3 %v104_v51  ;;  %255 = vmatpush.msra.mxu2 %v87_v53  ;;  %v177_v18 = vld [vmem:[#allocation6 + $0x3e0] sm:$0xff]  ;;  %v144_v20 = vld [vmem:[#allocation6 + $0x2d8] sm:$0xff]  ;;  %v159_v21 = vld [vmem:[#allocation6 + $0x350] sm:$0xff] }
  0x28   :  { %235 = vmatpush.msra.mxu1 %v71_v54  ;;  %216 = vmatpush.msra.mxu0 %v54_v56  ;;  %v176_v22 = vld [vmem:[#allocation6 + $0x3d8] sm:$0xff]  ;;  %v126_v23 = vld [vmem:[#allocation6 + $0x248] sm:$0xff]  ;;  %v143_v24 = vld [vmem:[#allocation6 + $0x2d0] sm:$0xff] }
  0x29   :  { %275 = vmatpush.msra.mxu3 %v103_v55  ;;  %256 = vmatpush.msra.mxu2 %v86_v57  ;;  %v158_v25 = vld [vmem:[#allocation6 + $0x348] sm:$0xff]  ;;  %v175_v26 = vld [vmem:[#allocation6 + $0x3d0] sm:$0xff]  ;;  %v52_v27 = vld [vmem:[#allocation3 + $0x8] sm:$0xff] }
  0x2a   :  { %236 = vmatpush.msra.mxu1 %v70_v58  ;;  %217 = vmatpush.msra.mxu0 %v53_v60  ;;  %v125_v28 = vld [vmem:[#allocation6 + $0x240] sm:$0xff]  ;;  %v142_v29 = vld [vmem:[#allocation6 + $0x2c8] sm:$0xff]  ;;  %v124_v32 = vld [vmem:[#allocation6 + $0x238] sm:$0xff]  ;;  %185 = vst [vmem:[#allocation1 + $0x20] ss:$4 sm:$0xff] %v52_v27 }
  0x2b   :  { %276 = vmatpush.msra.mxu3 %v102_v59  ;;  %257 = vmatpush.msra.mxu2 %v85_v61  ;;  %v157_v30 = vld [vmem:[#allocation6 + $0x340] sm:$0xff]  ;;  %v174_v31 = vld [vmem:[#allocation6 + $0x3c8] sm:$0xff]  ;;  %v156_v34 = vld [vmem:[#allocation6 + $0x338] sm:$0xff] }
  0x2c   :  { %282 = vmatpush.msrb.mxu0 %v132_v62  ;;  %237 = vmatpush.msra.mxu1 %v69_v0  ;;  %v141_v33 = vld [vmem:[#allocation6 + $0x2c0] sm:$0xff]  ;;  %v123_v36 = vld [vmem:[#allocation6 + $0x230] sm:$0xff]  ;;  %v140_v37 = vld [vmem:[#allocation6 + $0x2b8] sm:$0xff] }
  0x2d   :  { %322 = vmatpush.msrb.mxu2 %v164_v63  ;;  %277 = vmatpush.msra.mxu3 %v101_v1  ;;  %v173_v35 = vld [vmem:[#allocation6 + $0x3c0] sm:$0xff]  ;;  %v155_v38 = vld [vmem:[#allocation6 + $0x330] sm:$0xff]  ;;  %v172_v39 = vld [vmem:[#allocation6 + $0x3b8] sm:$0xff] }
  0x2e   :  { %283 = vmatpush.msrb.mxu0 %v131_v2  ;;  %302 = vmatpush.msrb.mxu1 %v148_v3  ;;  %v122_v40 = vld [vmem:[#allocation6 + $0x228] sm:$0xff]  ;;  %v139_v41 = vld [vmem:[#allocation6 + $0x2b0] sm:$0xff]  ;;  %v121_v45 = vld [vmem:[#allocation6 + $0x220] sm:$0xff] }
  0x2f   :  { %323 = vmatpush.msrb.mxu2 %v163_v4  ;;  %342 = vmatpush.msrb.mxu3 %v180_v5  ;;  %v154_v42 = vld [vmem:[#allocation6 + $0x328] sm:$0xff]  ;;  %v171_v43 = vld [vmem:[#allocation6 + $0x3b0] sm:$0xff]  ;;  %v153_v47 = vld [vmem:[#allocation6 + $0x320] sm:$0xff] }
  0x30   :  { %284 = vmatpush.msrb.mxu0 %v130_v6  ;;  %303 = vmatpush.msrb.mxu1 %v147_v7  ;;  %v188_v44 = vld.sshfl [vmem:[#allocation1 + $0x10] sm:$0xff pattern:$0x73625140]  ;;  %v138_v46 = vld [vmem:[#allocation6 + $0x2a8] sm:$0xff]  ;;  %v137_v52 = vld [vmem:[#allocation6 + $0x2a0] sm:$0xff] }
  0x31   :  { %324 = vmatpush.msrb.mxu2 %v162_v8  ;;  %343 = vmatpush.msrb.mxu3 %v179_v9  ;;  %v170_v48 = vld [vmem:[#allocation6 + $0x3a8] sm:$0xff]  ;;  %v189_v50 = vld.sshfl [vmem:[#allocation1 + $0x18] sm:$0xff pattern:$0x73625140]  ;;  %v119_v56 = vld [vmem:[#allocation6 + $0x210] sm:$0xff] }
  0x32   :  { %285 = vmatpush.msrb.mxu0 %v129_v10  ;;  %304 = vmatpush.msrb.mxu1 %v146_v11  ;;  %v186_v49 = vld.sshfl [vmem:[#allocation1] sm:$0xff pattern:$0x73625140]  ;;  %v120_v51 = vld [vmem:[#allocation6 + $0x218] sm:$0xff]  ;;  %v151_v58 = vld [vmem:[#allocation6 + $0x310] sm:$0xff]  ;;  %v510_v10 = vmov 0.0  }
  0x33   :  { %325 = vmatpush.msrb.mxu2 %v161_v13  ;;  %344 = vmatpush.msrb.mxu3 %v178_v14  ;;  %v152_v53 = vld [vmem:[#allocation6 + $0x318] sm:$0xff]  ;;  %v169_v54 = vld [vmem:[#allocation6 + $0x3a0] sm:$0xff]  ;;  %v187_v55 = vld.sshfl [vmem:[#allocation1 + $0x8] sm:$0xff pattern:$0x73625140] }
  0x34   :  { %286 = vmatpush.msrb.mxu0 %v128_v15  ;;  %305 = vmatpush.msrb.mxu1 %v145_v16  ;;  %v136_v57 = vld [vmem:[#allocation6 + $0x298] sm:$0xff]  ;;  %v118_v60 = vld [vmem:[#allocation6 + $0x208] sm:$0xff]  ;;  %v135_v61 = vld [vmem:[#allocation6 + $0x290] sm:$0xff]  ;;  %49 = vst [vmem:[#allocation2] sm:$0x3] %v510_v10 }
  0x35   :  { %326 = vmatpush.msrb.mxu2 %v160_v17  ;;  %345 = vmatpush.msrb.mxu3 %v177_v18  ;;  %v168_v59 = vld [vmem:[#allocation6 + $0x398] sm:$0xff]  ;;  %v150_v62 = vld [vmem:[#allocation6 + $0x308] sm:$0xff]  ;;  %v167_v63 = vld [vmem:[#allocation6 + $0x390] sm:$0xff] }
  0x36   :  { %287 = vmatpush.msrb.mxu0 %v127_v19  ;;  %306 = vmatpush.msrb.mxu1 %v144_v20  ;;  %v117_v0 = vld [vmem:[#allocation6 + $0x200] sm:$0xff]  ;;  %v134_v1 = vld [vmem:[#allocation6 + $0x288] sm:$0xff]  ;;  %v192_v5 = vld.sshfl [vmem:[#allocation1 + $0x30] sm:$0xff pattern:$0x73625140] }
  0x37   :  { %327 = vmatpush.msrb.mxu2 %v159_v21  ;;  %346 = vmatpush.msrb.mxu3 %v176_v22  ;;  %v149_v2 = vld [vmem:[#allocation6 + $0x300] sm:$0xff]  ;;  %v166_v3 = vld [vmem:[#allocation6 + $0x388] sm:$0xff] }
  0x38   :  { %288 = vmatpush.msrb.mxu0 %v126_v23  ;;  %307 = vmatpush.msrb.mxu1 %v143_v24  ;;  %v190_v4 = vld.sshfl [vmem:[#allocation1 + $0x20] sm:$0xff pattern:$0x73625140]  ;;  %v191_v8 = vld.sshfl [vmem:[#allocation1 + $0x28] sm:$0xff pattern:$0x73625140] }
  0x39   :  { %328 = vmatpush.msrb.mxu2 %v158_v25  ;;  %347 = vmatpush.msrb.mxu3 %v175_v26  ;;  %v133_v6 = vld [vmem:[#allocation6 + $0x280] sm:$0xff] }
  0x3a   :  { %289 = vmatpush.msrb.mxu0 %v125_v28  ;;  %308 = vmatpush.msrb.mxu1 %v142_v29  ;;  %v165_v7 = vld [vmem:[#allocation6 + $0x380] sm:$0xff] }
  0x3b   :  { %329 = vmatpush.msrb.mxu2 %v157_v30  ;;  %348 = vmatpush.msrb.mxu3 %v174_v31  ;;  %v193_v9 = vld.sshfl [vmem:[#allocation1 + $0x38] sm:$0xff pattern:$0x73625140]  ;;  %v50_v24 = vld [vmem:[#allocation2] sm:$0x3] }
  0x3c   :  { %290 = vmatpush.msrb.mxu0 %v124_v32  ;;  %309 = vmatpush.msrb.mxu1 %v141_v33  ;;  %v423_v28 = vld [vmem:[%s546_s2] ss:$0 sm:$0xff]  ;;  %s511_s2 = smov [#allocation8]  }
  0x3d   :  { %330 = vmatpush.msrb.mxu2 %v156_v34  ;;  %349 = vmatpush.msrb.mxu3 %v173_v35  ;;  %s404_s24 = sshll.u32 %s511_s2, 4  ;;  %s405_s24 = int_to_ptr.vmem [resolvable:$true] %s404_s24 }
  0x3e   :  { %291 = vmatpush.msrb.mxu0 %v123_v36  ;;  %310 = vmatpush.msrb.mxu1 %v140_v37 }
  0x3f   :  { %331 = vmatpush.msrb.mxu2 %v155_v38  ;;  %350 = vmatpush.msrb.mxu3 %v172_v39 }
  0x40   :  { %292 = vmatpush.msrb.mxu0 %v122_v40  ;;  %311 = vmatpush.msrb.mxu1 %v139_v41 }
  0x41   :  { %332 = vmatpush.msrb.mxu2 %v154_v42  ;;  %351 = vmatpush.msrb.mxu3 %v171_v43 }
  0x42   :  { %258 = vmatmul.f32.vlgmr.msra.gmra.mxu2 %v188_v44  ;;  %293 = vmatpush.msrb.mxu0 %v121_v45 }
  0x43   :  { %312 = vmatpush.msrb.mxu1 %v138_v46  ;;  %333 = vmatpush.msrb.mxu2 %v153_v47 }
  0x44   :  { %352 = vmatpush.msrb.mxu3 %v170_v48  ;;  %218 = vmatmul.f32.vlgmr.msra.gmra.mxu0 %v186_v49 }
  0x45   :  { %278 = vmatmul.f32.vlgmr.msra.gmra.mxu3 %v189_v50  ;;  %294 = vmatpush.msrb.mxu0 %v120_v51 }
  0x46   :  { %313 = vmatpush.msrb.mxu1 %v137_v52  ;;  %334 = vmatpush.msrb.mxu2 %v152_v53 }
  0x47   :  { %353 = vmatpush.msrb.mxu3 %v169_v54  ;;  %238 = vmatmul.f32.vlgmr.msra.gmra.mxu1 %v187_v55 }
  0x48   :  { %295 = vmatpush.msrb.mxu0 %v119_v56  ;;  %314 = vmatpush.msrb.mxu1 %v136_v57 }
  0x49   :  { %335 = vmatpush.msrb.mxu2 %v151_v58  ;;  %354 = vmatpush.msrb.mxu3 %v168_v59 }
  0x4a   :  { %296 = vmatpush.msrb.mxu0 %v118_v60  ;;  %315 = vmatpush.msrb.mxu1 %v135_v61 }
  0x4b   :  { %336 = vmatpush.msrb.mxu2 %v150_v62  ;;  %355 = vmatpush.msrb.mxu3 %v167_v63 }
  0x4c   :  { %297 = vmatpush.msrb.mxu0 %v117_v0  ;;  %316 = vmatpush.msrb.mxu1 %v134_v1 }
  0x4d   :  { %337 = vmatpush.msrb.mxu2 %v149_v2  ;;  %356 = vmatpush.msrb.mxu3 %v166_v3 }
  0x4e   :  { %298 = vmatmul.f32.vlgmr.msrb.gmra.mxu0 %v190_v4  ;;  %338 = vmatmul.f32.vlgmr.msrb.gmra.mxu2 %v192_v5 }
  0x4f   :  { %317 = vmatpush.msrb.mxu1 %v133_v6  ;;  %357 = vmatpush.msrb.mxu3 %v165_v7 }
  0x50   :  { %318 = vmatmul.f32.vlgmr.msrb.gmra.mxu1 %v191_v8  ;;  %358 = vmatmul.f32.vlgmr.msrb.gmra.mxu3 %v193_v9 }
  0xc1   :  { %v219_v11 = vpop.f32.mrf.mxu0 }
  0xc4   :  { %v239_v12 = vpop.f32.mrf.mxu1 }
  0xc5   :  { %v240_v13 = vadd.f32 %v239_v12, %v219_v11  ;;  %v259_v14 = vpop.f32.mrf.mxu2 }
  0xc7   :  { %v260_v15 = vadd.f32 %v259_v14, %v240_v13 }
  0xc8   :  { %v279_v16 = vpop.f32.mrf.mxu3 }
  0xc9   :  { %v280_v17 = vadd.f32 %v279_v16, %v260_v15 }
  0xcb   :  { %v299_v18 = vpop.f32.mrf.mxu0 }
  0xcc   :  { %v300_v19 = vadd.f32 %v299_v18, %v280_v17 }
  0xcd   :  { %v319_v20 = vpop.f32.mrf.mxu1 }
  0xce   :  { %v320_v21 = vadd.f32 %v319_v20, %v300_v19 }
  0xd1   :  { %v339_v22 = vpop.f32.mrf.mxu2 }
  0xd2   :  { %v340_v23 = vadd.f32 %v339_v22, %v320_v21 }
  0xd3   :  { %v359_v25 = vpop.f32.mrf.mxu3 }
  0xd4   :  { %v360_v26 = vadd.f32 %v359_v25, %v340_v23 }
  0xd6   :  { %v362_v27 = vadd.f32 %v360_v26, %v50_v24 }
  0xd8   :  { %363 = vst [vmem:[#allocation2] sm:$0x3] %v362_v27 }
  0xdf   :  { %v367_v29 = vld [vmem:[#allocation2] sm:$0x3] }
  0xe0   :  { %v372_v30 = vadd.f32 %v423_v28, %v367_v29 }
  0xe2   :  { %v374_v31 = vsel %vm373_vm0, %v372_v30, -inf }
  0xe3   :  { %375 = vmax.xlane.f32.xlu0 %v374_v31 }
 0x156   :  { %v376_v32 = vpop.xlane.xlu0 %375 }
 0x157   :  { %v377_v33 = vsub.f32 %v372_v30, %v376_v32 }
 0x159   :  { %v378_v34 = vmul.f32 1.442695, %v377_v33 }
 0x15b   :  { %424 = vpow2.f32 %v378_v34 }
 0x161   :  { %v425_v35 = vpop.eup %424 }
 0x162   :  { %v380_v36 = vsel %vm373_vm0, %v425_v35, 0.0 }
 0x163   :  { %381 = vadd.xlane.f32.xlu0 %v380_v36 }
 0x1d6   :  { %v382_v37 = vpop.xlane.xlu0 %381 }
 0x1d7   :  { %426 = vrcp.f32 %v382_v37  ;;  %v394_v41 = vand.u32 2147483648, %v382_v37  ;;  %v392_v43 = vand.u32 2147483647, %v382_v37  ;;  %vm388_vm2 = vweird.f32 %v382_v37 }
 0x1d9   :  { %v395_v45 = vor.u32 1.1754944e-38, %v394_v41  ;;  %vm393_vm4 = vcmp.eq.f32.partialorder %v392_v43, 8.507059e+37 }
 0x1dd   :  { %v427_v38 = vpop.eup %426 }
 0x1de   :  { %v384_v39 = vmul.f32 %v427_v38, %v382_v37  ;;  %vm389_vm1 = vweird.f32 %v427_v38 }
 0x1df   :  { %vm390_vm3 = vmor %vm388_vm2, %vm389_vm1 }
 0x1e0   :  { %v385_v40 = vsub.f32 1.0, %v384_v39 }
 0x1e2   :  { %v386_v42 = vmul.f32 %v427_v38, %v385_v40 }
 0x1e4   :  { %v387_v44 = vadd.f32 %v427_v38, %v386_v42 }
 0x1e6   :  { %v391_v46 = vsel %vm390_vm3, %v427_v38, %v387_v44 }
 0x1e7   :  { %v396_v47 = vsel %vm393_vm4, %v395_v45, %v391_v46 }
 0x1e8   :  { %v397_v48 = vmul.f32 %v425_v35, %v396_v47 }
 0x1ea   :  { %398 = vst [vmem:[#allocation8] sm:$0x3] %v397_v48 }
 0x1eb   :  { %409 = dma.vmem_to_hbm [thread:$0]  %s405_s24, 32, %s407_s27, [#allocation5]  }
 0x1ec   :  { %504 = dma.done.wait [#allocation5], 32  }
 0x1ed   :  { %505 = vsyncadd [#allocation5], 4294967264 }
 0x1ee   :  { %414 = vsyncpa [#allocation4], 1 }
 0x1ef   :  { %415 = vsyncpa [#allocation7], 1 }
 0x1f0   :  { %416 = vsyncpa [#allocation5], 1 }

</bundles_post_ra>
